<compile_context>
chip_gen: v6e
topology: v6e:2x2x1
jax: 0.10.0
libtpu: 0.0.40
codegen_flags: <defaults>
</compile_context>

<pallas_src>
import jax
import jax.numpy as jnp
from jax.experimental import pallas as pl
from jax.experimental.pallas import tpu as pltpu


def _pw_conv1d_bias_kernel(x_ref, w_ref, b_ref, o_ref):
    # x_ref: (C_in, tt)  w_ref: (tco, C_in)  b_ref: (tco, 1) f32  o_ref: (tco, tt)
    acc = jnp.dot(w_ref[...], x_ref[...], preferred_element_type=jnp.float32)
    o_ref[...] = (acc + b_ref[...]).astype(o_ref.dtype)


def _pw_conv1d_nobias_kernel(x_ref, w_ref, o_ref):
    acc = jnp.dot(w_ref[...], x_ref[...], preferred_element_type=jnp.float32)
    o_ref[...] = acc.astype(o_ref.dtype)


def pointwise_conv1d(x, weight, bias=None, *, stride: int = 1, padding: int = 0,
                     time_tile: int = 2048, cout_tile: int | None = None,
                     time_buffers: int = 2):
    """Pointwise (kernel_size=1) Conv1d.

    x:      (batch, in_channels, time)
    weight: (out_channels, in_channels) or PyTorch layout (out_channels, in_channels, 1)
    bias:   (out_channels,) or None
    returns (batch, out_channels, time_out)
    """
    if weight.ndim == 3:                       # PyTorch Conv1d weight (O, I, 1)
        weight = weight[..., 0]
    C_out, C_in = weight.shape
    B, c_in_x, _ = x.shape
    assert c_in_x == C_in

    # dtype hygiene: matched MXU operand dtypes (bf16 x -> bf16 weight); bias is
    # kept f32 so the bias add happens directly on the f32 accumulator.
    weight = weight.astype(x.dtype)
    bias2 = None
    if bias is not None:
        bias2 = bias.astype(jnp.float32).reshape(C_out, 1)

    # kernel_size == 1: padding appends zero timesteps, stride subsamples.
    # NOTE: for stride>1 / padding>0 this is one extra HBM pass over x done by
    # XLA before the kernel (pointwise convs normally use stride=1/padding=0).
    # TODO(synk): fold stride into the kernel with a lane-strided x read
    # (pl.ds(..., stride=stride)) to remove that extra pass.
    if padding:
        x = jnp.pad(x, ((0, 0), (0, 0), (padding, padding)))
    if stride != 1:
        x = x[:, :, ::stride]
    T_out = x.shape[2]

    # ---- time tile: full extent if it fits, else a multiple of 256 (>=128) ----
    if T_out <= time_tile:
        tt = T_out
    else:
        tt = (min(time_tile, T_out) // 256) * 256
        tt = max(128, tt)

    # ---- chip-aware VMEM budget (v7x = 64 MiB physical, v5e/v6e = 128 MiB) ----
    try:
        vmem_cap = int(pltpu.get_tpu_info().vmem_capacity_bytes)
    except Exception:
        vmem_cap = 64 * 1024 * 1024            # assume the smallest (v7x)
    vmem_budget = int(vmem_cap * 0.80)         # headroom below physical

    x_item = x.dtype.itemsize
    w_item = weight.dtype.itemsize             # == x_item after the cast

    # ---- optional C_out tiling so a huge resident weight doesn't force tiny tt ----
    if cout_tile is not None:
        tco = min(cout_tile, C_out)
        assert C_out % tco == 0 and (tco == C_out or tco % 8 == 0)
    else:
        tco = C_out
        while (tco > 256 and tco % 2 == 0 and (tco // 2) % 8 == 0
               and tco * C_in * w_item > vmem_budget // 4):
            tco //= 2
    n_co = C_out // tco

    def _vmem_need(tt_, tco_):
        need = 2 * C_in * tt_ * x_item                       # x tile (double-buffered)
        need += 2 * tco_ * tt_ * x_item                      # out tile (double-buffered)
        need += (1 if tco_ == C_out else 2) * tco_ * C_in * w_item   # weight
        need += 2 * tco_ * 4                                 # f32 bias
        if x_item < 4:
            need += 2 * tco_ * tt_ * 4                       # f32 matmul temp before cast
        return need

    # shrink the time tile (keeping it a multiple of 128) until the working set fits
    while tt >= 256 and tt % 128 == 0 and 2 * _vmem_need(tt, tco) > vmem_budget:
        tt = max(128, ((tt // 2) // 128) * 128)

    vmem_limit = int(min(vmem_budget,
                         max(32 * 1024 * 1024, 2 * _vmem_need(tt, tco))))

    grid = (B, n_co, pl.cdiv(T_out, tt))

    # ---- BlockSpecs ----
    if time_buffers != 2:
        x_spec = pl.BlockSpec((None, C_in, tt), lambda b, co, t: (b, 0, t),
                              pipeline_mode=pl.Buffered(time_buffers))
    else:
        x_spec = pl.BlockSpec((None, C_in, tt), lambda b, co, t: (b, 0, t))

    if n_co == 1:
        # constant index map -> resident, single-buffered weight / bias
        w_spec = pl.BlockSpec((C_out, C_in), lambda b, co, t: (0, 0),
                              pipeline_mode=pl.Buffered(1))
        b_spec = pl.BlockSpec((C_out, 1), lambda b, co, t: (0, 0),
                              pipeline_mode=pl.Buffered(1))
    else:
        w_spec = pl.BlockSpec((tco, C_in), lambda b, co, t: (co, 0))
        b_spec = pl.BlockSpec((tco, 1), lambda b, co, t: (co, 0))

    out_spec = pl.BlockSpec((None, tco, tt), lambda b, co, t: (b, co, t))

    if bias2 is not None:
        kernel = _pw_conv1d_bias_kernel
        in_specs = [x_spec, w_spec, b_spec]
        args = (x, weight, bias2)
    else:
        kernel = _pw_conv1d_nobias_kernel
        in_specs = [x_spec, w_spec]
        args = (x, weight)

    flops = 2 * B * C_out * C_in * T_out
    bytes_accessed = (B * C_in * T_out * x_item * n_co      # x re-read per C_out tile
                      + B * C_out * T_out * x_item
                      + C_out * C_in * w_item
                      + (C_out * 4 if bias2 is not None else 0))

    out = pl.pallas_call(
        kernel,
        out_shape=jax.ShapeDtypeStruct((B, C_out, T_out), x.dtype),
        grid_spec=pltpu.PrefetchScalarGridSpec(
            num_scalar_prefetch=0,
            grid=grid,
            in_specs=in_specs,
            out_specs=out_spec,
        ),
        compiler_params=pltpu.CompilerParams(
            dimension_semantics=("parallel", "parallel", "parallel"),
            vmem_limit_bytes=vmem_limit,
        ),
        cost_estimate=pl.CostEstimate(
            flops=flops, transcendentals=0, bytes_accessed=bytes_accessed),
    )(*args)
    return out


if __name__ == "__main__":
    batch, in_channels, out_channels, time = 2, 32, 64, 16

    key = jax.random.PRNGKey(0)
    kx, kw, kb = jax.random.split(key, 3)
    x = jax.random.normal(kx, (batch, in_channels, time), jnp.float32)
    # PyTorch Conv1d default init scale ~ 1/sqrt(fan_in * kernel_size)
    bound = 1.0 / (in_channels ** 0.5)
    weight = jax.random.uniform(kw, (out_channels, in_channels, 1),
                                jnp.float32, -bound, bound)
    bias = jax.random.uniform(kb, (out_channels,), jnp.float32, -bound, bound)

    # 1) default path (stride=1, padding=0, bias)
    out = jax.block_until_ready(pointwise_conv1d(x, weight, bias))
    ref = jnp.einsum("oi,bit->bot", weight[..., 0], x,
                     precision=jax.lax.Precision.HIGHEST) + bias[None, :, None]
    assert out.shape == (batch, out_channels, time)
    assert jnp.allclose(out, ref, atol=2e-2, rtol=2e-2), float(
        jnp.max(jnp.abs(out - ref)))

    # 2) no-bias path
    out_nb = jax.block_until_ready(pointwise_conv1d(x, weight, None))
    ref_nb = jnp.einsum("oi,bit->bot", weight[..., 0], x,
                        precision=jax.lax.Precision.HIGHEST)
    assert jnp.allclose(out_nb, ref_nb, atol=2e-2, rtol=2e-2), float(
        jnp.max(jnp.abs(out_nb - ref_nb)))

    # 3) stride / padding path (wrapper preprocessing, same Conv1d semantics)
    out_sp = jax.block_until_ready(
        pointwise_conv1d(x, weight, bias, stride=2, padding=1))
    xp = jnp.pad(x, ((0, 0), (0, 0), (1, 1)))[:, :, ::2]
    ref_sp = jnp.einsum("oi,bit->bot", weight[..., 0], xp,
                        precision=jax.lax.Precision.HIGHEST) + bias[None, :, None]
    assert out_sp.shape == ref_sp.shape
    assert jnp.allclose(out_sp, ref_sp, atol=2e-2, rtol=2e-2), float(
        jnp.max(jnp.abs(out_sp - ref_sp)))

    print("KERNEL_OK")
</pallas_src>

<mosaic_0001>
module attributes {stable_mosaic.version = 11 : i64} {
  func.func @_pw_conv1d_bias_kernel(%arg0: i32, %arg1: i32, %arg2: i32, %arg3: memref<1x32x16xf32, #tpu.memory_space<vmem>>, %arg4: memref<64x32xf32, #tpu.memory_space<vmem>>, %arg5: memref<64x1xf32, #tpu.memory_space<vmem>>, %arg6: memref<1x64x16xf32, #tpu.memory_space<vmem>>) attributes {dimension_semantics = [#tpu.dimension_semantics<parallel>, #tpu.dimension_semantics<parallel>, #tpu.dimension_semantics<parallel>], iteration_bounds = array<i64: 2, 1, 1>, scalar_prefetch = 0 : i64, scratch_operands = 0 : i64, tpu.core_type = #tpu.core_type<tc>, window_params = [{transform_indices = @transform_0, window_bounds = array<i64: 1, 32, 16>}, {pipeline_mode = #tpu.pipeline_mode<synchronous>, transform_indices = @transform_1, window_bounds = array<i64: 64, 32>}, {pipeline_mode = #tpu.pipeline_mode<synchronous>, transform_indices = @transform_2, window_bounds = array<i64: 64, 1>}, {transform_indices = @transform_3, window_bounds = array<i64: 1, 64, 16>}]} {
    %c0 = arith.constant 0 : index
    %c0_0 = arith.constant 0 : index
    %0 = vector.load %arg4[%c0, %c0_0] : memref<64x32xf32, #tpu.memory_space<vmem>>, vector<64x32xf32>
    %c0_1 = arith.constant 0 : index
    %c0_2 = arith.constant 0 : index
    %c0_3 = arith.constant 0 : index
    %1 = vector.load %arg3[%c0_1, %c0_2, %c0_3] : memref<1x32x16xf32, #tpu.memory_space<vmem>>, vector<1x32x16xf32>
    %2 = vector.shape_cast %1 : vector<1x32x16xf32> to vector<32x16xf32>
    %cst = arith.constant dense<0.000000e+00> : vector<64x16xf32>
    %3 = tpu.matmul %0, %2, %cst {dimension_numbers = #tpu.dot_dimension_numbers<[1], [0], [0], [1], [0, 0, 1, 1], [], []>} : vector<64x32xf32>, vector<32x16xf32>, vector<64x16xf32> -> vector<64x16xf32>
    %c0_4 = arith.constant 0 : index
    %c0_5 = arith.constant 0 : index
    %4 = vector.load %arg5[%c0_4, %c0_5] : memref<64x1xf32, #tpu.memory_space<vmem>>, vector<64x1xf32>
    %5 = vector.broadcast %4 : vector<64x1xf32> to vector<64x16xf32>
    %6 = arith.addf %3, %5 : vector<64x16xf32>
    %c0_6 = arith.constant 0 : index
    %c0_7 = arith.constant 0 : index
    %c0_8 = arith.constant 0 : index
    %7 = vector.load %arg6[%c0_6, %c0_7, %c0_8] : memref<1x64x16xf32, #tpu.memory_space<vmem>>, vector<1x64x16xf32>
    %8 = vector.shape_cast %7 : vector<1x64x16xf32> to vector<64x16xf32>
    %9 = vector.shape_cast %6 : vector<64x16xf32> to vector<1x64x16xf32>
    tpu.vector_store %arg6[%c0_6, %c0_7, %c0_8], %9 {strides = array<i32>} : memref<1x64x16xf32, #tpu.memory_space<vmem>>, vector<1x64x16xf32>,
    return
  }
  func.func @transform_0(%arg0: i32, %arg1: i32, %arg2: i32) -> (i32, i32, i32) {
    %c0_i32 = arith.constant 0 : i32
    %c0_i32_0 = arith.constant 0 : i32
    return %arg0, %c0_i32, %arg2 : i32, i32, i32
  }
  func.func @transform_1(%arg0: i32, %arg1: i32, %arg2: i32) -> (i32, i32) {
    %c0_i32 = arith.constant 0 : i32
    %c0_i32_0 = arith.constant 0 : i32
    %c0_i32_1 = arith.constant 0 : i32
    return %c0_i32, %c0_i32_0 : i32, i32
  }
  func.func @transform_2(%arg0: i32, %arg1: i32, %arg2: i32) -> (i32, i32) {
    %c0_i32 = arith.constant 0 : i32
    %c0_i32_0 = arith.constant 0 : i32
    %c0_i32_1 = arith.constant 0 : i32
    return %c0_i32, %c0_i32_0 : i32, i32
  }
  func.func @transform_3(%arg0: i32, %arg1: i32, %arg2: i32) -> (i32, i32, i32) {
    %c0_i32 = arith.constant 0 : i32
    return %arg0, %arg1, %arg2 : i32, i32, i32
  }
}

</mosaic_0001>

<bundles_post_ra>
// kernel: tpu_custom_call.1
= control target key start
LH: loop header
LB: loop body
LE: loop exit
PB: predicated region body
PF: predicated region fallthrough
CT: control target
= control target key end

     0   :  { %s652_s12 = smov 0   ;;  %s654_s13 = smov 0   ;;  %s753_s0 = inlined_call_operand.vmem [shape: f32[2,32,16], index: 0, kind: input, shape index: {}]   ;;  %s754_s1 = inlined_call_operand.vmem [shape: f32[64,32], index: 1, kind: input, shape index: {}]   ;;  %s755_s2 = inlined_call_operand.vmem [shape: f32[64,1], index: 2, kind: input, shape index: {}]   ;;  %s756_s3 = inlined_call_operand.vmem [shape: f32[2,64,16], index: 3, kind: output, shape index: {}]  }
   0x1   :  { %s656_s14 = smov 0  }
   0x2 LB: > { %s32_s15 = sadd.s32 1, %s625_s13  ;;  %p523_p0 = scmp.ge.s32.totalorder %s629_s14, 1  ;;  %s629_s14 = sphi %s656_s14, %s13_s14   ;;  %s625_s13 = sphi %s654_s13, %s758_s13   ;;  %s621_s12 = sphi %s652_s12, %s757_s12  }
   0x3   : > { %p34_p1 = scmp.ge.s32.totalorder %s32_s15, 2  ;;  %p165_p2 = scmp.lt.s32.totalorder %s629_s14, 3 }
   0x5   : > { %s760_s15 = smov (%p34_p1, %s32_s15), 0  ;;  %p166_p3 = pnand %p523_p0, %p165_p2 }
   0x6   : > { %p199_p4 = scmp.lt.s32.totalorder (!%p166_p3), %s621_s12, 1 }
   0x7   : > { %169 = sbr.rel (%p166_p3) target bundleno = 226 (0xe2), region = 32 }
   0xc   : > { %v220_v0 = vld [vmem:[%s754_s1] sm:$0xff]  ;;  %vm280_vm0 = vcmask 261120   ;;  %s762_s12 = smov (!%p199_p4, %s621_s12), 1  ;;  %v631_v2 = vmov 0   ;;  %v234_v3 = vld [vmem:[%s755_s2 + $0x10] sm:$0xff]  ;;  %v221_v9 = vld [vmem:[%s754_s1 + $0x8] sm:$0xff] }
   0xd   : > { %v224_v1 = vld [vmem:[%s754_s1 + $0x20] sm:$0xff]  ;;  %560 = vmatprep.mubr.msk.f32.mxu0 %vm280_vm0, %v220_v0  ;;  %606 = vset.pattern.permute.xlu1 %v631_v2  ;;  %s538_s24 = sshll.u32 %s762_s12, 5  ;;  %v225_v10 = vld [vmem:[%s754_s1 + $0x28] sm:$0xff]  ;;  %v222_v11 = vld [vmem:[%s754_s1 + $0x10] sm:$0xff]  ;;  %s539_s29 = sshll.u32 %s762_s12, 6  ;;  %vm410_vm1 = vcmask 130048  }
   0xe   : > { %566 = vmatprep.mubr.msk.f32.mxu1 %vm280_vm0, %v224_v1  ;;  %605 = vset.pattern.permute.xlu0 %v631_v2  ;;  %v232_v4 = vld [vmem:[%s755_s2] sm:$0xff]  ;;  %s206_s27 = scalar_lea.vmem %s753_s0, %s538_s24  ;;  %v226_v12 = vld [vmem:[%s754_s1 + $0x30] sm:$0xff]  ;;  %v235_v13 = vld [vmem:[%s755_s2 + $0x18] sm:$0xff]  ;;  %s218_s5 = scalar_lea.vmem %s756_s3, %s539_s29 }
   0xf   : > { %252 = vperm.xlu1 %606, %v234_v3   ;;  %242 = vperm.xlu0 %605, %v232_v4   ;;  %v231_v5 = vld [vmem:[%s206_s27 + $0x18] sm:$0xff]  ;;  %v230_v6 = vld [vmem:[%s206_s27 + $0x10] sm:$0xff]  ;;  %v229_v7 = vld [vmem:[%s206_s27 + $0x8] sm:$0xff] }
  0x10   : > { %552 = vmatprep.subr.mxu0 %v231_v5  ;;  %572 = vmatprep.subr.mxu1 %v231_v5  ;;  %v228_v8 = vld [vmem:[%s206_s27] sm:$0xff]  ;;  %v233_v14 = vld [vmem:[%s755_s2 + $0x8] sm:$0xff]  ;;  %v223_v15 = vld [vmem:[%s754_s1 + $0x18] sm:$0xff] }
  0x11   : > { %553 = vmatpush3.msra.mxu0 %v231_v5  ;;  %576 = vmatpush3.msra.mxu1 %v231_v5  ;;  %v227_v16 = vld [vmem:[%s754_s1 + $0x38] sm:$0xff]  ;;  %v237_v17 = vld [vmem:[%s755_s2 + $0x28] sm:$0xff]  ;;  %v236_v18 = vld [vmem:[%s755_s2 + $0x20] sm:$0xff] }
  0x12   : > { %554 = vmatprep.subr.mxu0 %v230_v6  ;;  %573 = vmatprep.subr.mxu1 %v230_v6  ;;  %v239_v19 = vld [vmem:[%s755_s2 + $0x38] sm:$0xff]  ;;  %v238_v20 = vld [vmem:[%s755_s2 + $0x30] sm:$0xff] }
  0x13   : > { %555 = vmatpush3.msra.mxu0 %v230_v6  ;;  %577 = vmatpush3.msra.mxu1 %v230_v6 }
  0x14   : > { %556 = vmatprep.subr.mxu0 %v229_v7  ;;  %574 = vmatprep.subr.mxu1 %v229_v7 }
  0x15   : > { %557 = vmatpush3.msra.mxu0 %v229_v7  ;;  %578 = vmatpush3.msra.mxu1 %v229_v7 }
  0x16   : > { %558 = vmatprep.subr.mxu0 %v228_v8  ;;  %575 = vmatprep.subr.mxu1 %v228_v8 }
  0x17   : > { %559 = vmatpush3.msra.mxu0 %v228_v8  ;;  %579 = vmatpush3.msra.mxu1 %v228_v8 }
  0x18   : > { %561 = vmatmul.mubr.msk.f32.vlgmr.msra.gmra.mxu0 %vm280_vm0, %v221_v9  ;;  %567 = vmatmul.mubr.msk.f32.vlgmr.msra.gmra.mxu1 %vm280_vm0, %v225_v10 }
  0x19   : > { %563 = vmatprep.mubr.msk.f32.mxu0 %vm280_vm0, %v222_v11  ;;  %569 = vmatprep.mubr.msk.f32.mxu1 %vm280_vm0, %v226_v12 }
  0x1a   : > { %257 = vperm.xlu1 %606, %v235_v13   ;;  %247 = vperm.xlu0 %605, %v233_v14  }
  0x1c   : > { %564 = vmatmul.mubr.msk.f32.gmra.mxu0 %vm280_vm0, %v223_v15  ;;  %570 = vmatmul.mubr.msk.f32.gmra.mxu1 %vm280_vm0, %v227_v16 }
  0x1e   : > { %267 = vperm.xlu1 %606, %v237_v17   ;;  %262 = vperm.xlu0 %605, %v236_v18  }
  0x22   : > { %277 = vperm.xlu1 %606, %v239_v19   ;;  %272 = vperm.xlu0 %605, %v238_v20  }
  0x8a   : > { %v253_v21 = vpop.permute.xlu1 %252  ;;  %v243_v22 = vpop.permute.xlu0 %242 }
  0x95   : > { %v258_v23 = vpop.permute.xlu1 %257  ;;  %v248_v24 = vpop.permute.xlu0 %247 }
  0x99   : > { %v268_v25 = vpop.permute.xlu1 %267  ;;  %v263_v26 = vpop.permute.xlu0 %262 }
  0x9d   : > { %v278_v33 = vpop.permute.xlu1 %277  ;;  %v273_v38 = vpop.permute.xlu0 %272 }
  0xd8   : > { %v562_v27 = vpop.f32.mrf.mxu0  ;;  %v568_v28 = vpop.f32.mrf.mxu1 }
  0xd9   : > { %v377_v29 = vadd.f32 %v562_v27, %v248_v24  ;;  %v397_v30 = vadd.f32 %v568_v28, %v268_v25 }
  0xda   : > { %v371_v31 = vpop.f32.mrf.mxu0  ;;  %v391_v32 = vpop.f32.mrf.mxu1 }
  0xdb   : > { %412 = vst.msk [vmem:[%s218_s5 + $0x8] sm:$0xff] %vm410_vm1, %v377_v29  ;;  %416 = vst.msk [vmem:[%s218_s5 + $0x28] sm:$0xff] %vm410_vm1, %v397_v30  ;;  %v372_v34 = vadd.f32 %v371_v31, %v243_v22  ;;  %v392_v35 = vadd.f32 %v391_v32, %v263_v26 }
  0xdc   : > { %v565_v36 = vpop.f32.mrf.mxu0  ;;  %v571_v37 = vpop.f32.mrf.mxu1 }
  0xdd   : > { %411 = vst.msk [vmem:[%s218_s5] sm:$0xff] %vm410_vm1, %v372_v34  ;;  %415 = vst.msk [vmem:[%s218_s5 + $0x20] sm:$0xff] %vm410_vm1, %v392_v35  ;;  %v387_v39 = vadd.f32 %v565_v36, %v258_v23  ;;  %v407_v40 = vadd.f32 %v571_v37, %v278_v33 }
  0xde   : > { %v381_v41 = vpop.f32.mrf.mxu0  ;;  %v401_v42 = vpop.f32.mrf.mxu1 }
  0xdf   : > { %414 = vst.msk [vmem:[%s218_s5 + $0x18] sm:$0xff] %vm410_vm1, %v387_v39  ;;  %418 = vst.msk [vmem:[%s218_s5 + $0x38] sm:$0xff] %vm410_vm1, %v407_v40  ;;  %v382_v43 = vadd.f32 %v381_v41, %v253_v21  ;;  %v402_v44 = vadd.f32 %v401_v42, %v273_v38 }
  0xe1   : > { %413 = vst.msk [vmem:[%s218_s5 + $0x10] sm:$0xff] %vm410_vm1, %v382_v43  ;;  %417 = vst.msk [vmem:[%s218_s5 + $0x30] sm:$0xff] %vm410_vm1, %v402_v44 }
  0xe2 PF: > { %s13_s14 = sadd.s32 1, %s629_s14   ;;  %s757_s12 = smov %s625_s13 }
  0xe3   : > { %p10_p5 = scmp.ge.s32.totalorder %s13_s14, 4   ;;  %s758_s13 = smov %s760_s15 }
  0xe5   :  { %12 = sbr.rel (!%p10_p5) target bundleno = 2 (0x2), region = 62 }

</bundles_post_ra>
